<compile_context>
chip_gen: v7x
topology: tpu7x:2x2x1
jax: 0.10.0
libtpu: 0.0.40
codegen_flags: <defaults>
</compile_context>

<pallas_src>
import functools

import jax
import jax.numpy as jnp
from jax.experimental import pallas as pl
from jax.experimental.pallas import tpu as pltpu


def _attention_gate_kernel(g_ref, x_ref,
                           wg_ref, wx_ref, b_ref,
                           wpsi_ref, bpsi_ref,
                           out_ref):
    """One (batch, pixel-tile): fused 1x1 convs + ReLU + psi-conv + sigmoid + gate."""
    g = g_ref[0, :, :]            # (Cg,  T)  channels on sublanes, pixels on lanes
    x = x_ref[0, :, :]            # (Cin, T)

    # W_g(g) + W_x(x) + (bg + bx): two skinny MXU matmuls, one broadcast bias add.
    z = (jnp.dot(wg_ref[...], g, preferred_element_type=jnp.float32)
         + jnp.dot(wx_ref[...], x, preferred_element_type=jnp.float32)
         + b_ref[...])            # (Cout, T); (Cout, 1) bias broadcasts over lanes
    h = jnp.maximum(z, 0.0)       # ReLU

    # psi: 1x1 conv to 1 channel (+ folded BN) + sigmoid -> (1, T)
    psi_lin = (jnp.dot(wpsi_ref[...], h, preferred_element_type=jnp.float32)
               + bpsi_ref[0, 0])  # scalar bias read from SMEM
    psi = jax.nn.sigmoid(psi_lin)

    # Gate the skip connection: x * psi (psi broadcasts over the channel sublanes).
    out_ref[0, :, :] = (x * psi).astype(out_ref.dtype)


def _round_up(a, b):
    return (a + b - 1) // b * b


def _fold_bn(w, b, gamma, beta, mean, var, eps=1e-5):
    """Fold eval-mode BatchNorm into a 1x1 conv expressed as (Cout, Cin) matmul."""
    scale = gamma / jnp.sqrt(var + eps)          # (Cout,)
    w_eff = w * scale[:, None]                   # (Cout, Cin)
    b_eff = (b - mean) * scale + beta            # (Cout,)
    return w_eff, b_eff


@functools.partial(jax.jit, static_argnames=("tile_p",))
def attention_gate(g, x, params, tile_p=2048):
    """g: (N, Cg, H, W), x: (N, Cin, H, W)  ->  (N, Cin, H, W)."""
    N, Cg, H, W = g.shape
    _, Cin, _, _ = x.shape

    wg, bg = _fold_bn(params["wg"], params["bg"], params["bn_g_gamma"],
                      params["bn_g_beta"], params["bn_g_mean"], params["bn_g_var"])
    wx, bx = _fold_bn(params["wx"], params["bx"], params["bn_x_gamma"],
                      params["bn_x_beta"], params["bn_x_mean"], params["bn_x_var"])
    wpsi, bpsi = _fold_bn(params["wpsi"], params["bpsi"], params["bn_p_gamma"],
                          params["bn_p_beta"], params["bn_p_mean"], params["bn_p_var"])
    Cout = wg.shape[0]

    # NCHW -> (N, C, P) with P = H*W.  Contiguous reshape: no data movement.
    HW = H * W
    g3 = g.reshape(N, Cg, HW).astype(jnp.float32)
    x3 = x.reshape(N, Cin, HW).astype(jnp.float32)

    # Pixel (lane) tile: as large as requested, a multiple of 128 lanes; the
    # pixel axis is padded so the grid divides exactly (padded columns are
    # computed on zeros and sliced off afterwards).
    T = _round_up(min(tile_p, _round_up(HW, 128)), 128)
    HWp = _round_up(HW, T)
    if HWp != HW:
        pad = HWp - HW
        g3 = jnp.pad(g3, ((0, 0), (0, 0), (0, pad)))
        x3 = jnp.pad(x3, ((0, 0), (0, 0), (0, pad)))

    b_comb = (bg + bx).reshape(Cout, 1)      # combined conv/BN biases
    bpsi2 = bpsi.reshape(1, 1)               # scalar psi bias -> SMEM

    grid = (N, HWp // T)

    flops = 2 * N * HW * (Cg * Cout + Cin * Cout + Cout)
    bytes_accessed = 4 * N * HW * (Cg + 2 * Cin)   # read g, read x, write out

    out3 = pl.pallas_call(
        _attention_gate_kernel,
        out_shape=jax.ShapeDtypeStruct((N, Cin, HWp), jnp.float32),
        grid_spec=pltpu.PrefetchScalarGridSpec(
            num_scalar_prefetch=0,
            grid=grid,
            in_specs=[
                pl.BlockSpec((1, Cg, T), lambda n, p: (n, 0, p)),    # g tile
                pl.BlockSpec((1, Cin, T), lambda n, p: (n, 0, p)),   # x tile
                pl.BlockSpec((Cout, Cg), lambda n, p: (0, 0)),       # Wg (folded BN)
                pl.BlockSpec((Cout, Cin), lambda n, p: (0, 0)),      # Wx (folded BN)
                pl.BlockSpec((Cout, 1), lambda n, p: (0, 0)),        # bg + bx
                pl.BlockSpec((1, Cout), lambda n, p: (0, 0)),        # Wpsi (folded BN)
                pl.BlockSpec(memory_space=pltpu.MemorySpace.SMEM),   # bpsi scalar
            ],
            out_specs=pl.BlockSpec((1, Cin, T), lambda n, p: (n, 0, p)),
        ),
        compiler_params=pltpu.CompilerParams(
            dimension_semantics=("parallel", "parallel")),
        cost_estimate=pl.CostEstimate(flops=flops,
                                      transcendentals=N * HW,
                                      bytes_accessed=bytes_accessed),
    )(g3, x3, wg, wx, b_comb, wpsi, bpsi2)

    # (N, Cin, HWp) -> NCHW (slice off pixel padding; reshape is free).
    return out3[:, :, :HW].reshape(N, Cin, H, W)


def _reference(g, x, params):
    """Pure-JAX reference (same eval-mode BN fold) for correctness check."""
    wg, bg = _fold_bn(params["wg"], params["bg"], params["bn_g_gamma"],
                      params["bn_g_beta"], params["bn_g_mean"], params["bn_g_var"])
    wx, bx = _fold_bn(params["wx"], params["bx"], params["bn_x_gamma"],
                      params["bn_x_beta"], params["bn_x_mean"], params["bn_x_var"])
    wpsi, bpsi = _fold_bn(params["wpsi"], params["bpsi"], params["bn_p_gamma"],
                          params["bn_p_beta"], params["bn_p_mean"], params["bn_p_var"])
    g1 = jnp.einsum("oc,nchw->nohw", wg, g) + bg[None, :, None, None]
    x1 = jnp.einsum("oc,nchw->nohw", wx, x) + bx[None, :, None, None]
    h = jnp.maximum(g1 + x1, 0.0)
    psi = jax.nn.sigmoid(jnp.einsum("ko,nohw->nkhw", wpsi, h)
                         + bpsi[None, :, None, None])
    return x * psi


def _init_params(key, in_channels, gate_channels, out_channels):
    ks = jax.random.split(key, 6)
    params = {
        # conv weights stored as (Cout, Cin) (PyTorch 1x1-conv weight squeezed)
        "wg": jax.random.normal(ks[0], (out_channels, gate_channels), jnp.float32) * 0.1,
        "bg": jax.random.normal(ks[1], (out_channels,), jnp.float32) * 0.1,
        "wx": jax.random.normal(ks[2], (out_channels, in_channels), jnp.float32) * 0.1,
        "bx": jax.random.normal(ks[3], (out_channels,), jnp.float32) * 0.1,
        "wpsi": jax.random.normal(ks[4], (1, out_channels), jnp.float32) * 0.1,
        "bpsi": jax.random.normal(ks[5], (1,), jnp.float32) * 0.1,
        # deterministic (non-trivial) BN eval-mode stats / affine params
        "bn_g_gamma": jnp.linspace(0.8, 1.2, out_channels, dtype=jnp.float32),
        "bn_g_beta": jnp.linspace(-0.1, 0.1, out_channels, dtype=jnp.float32),
        "bn_g_mean": jnp.linspace(-0.05, 0.05, out_channels, dtype=jnp.float32),
        "bn_g_var": jnp.linspace(0.9, 1.1, out_channels, dtype=jnp.float32),
        "bn_x_gamma": jnp.linspace(1.1, 0.9, out_channels, dtype=jnp.float32),
        "bn_x_beta": jnp.linspace(0.05, -0.05, out_channels, dtype=jnp.float32),
        "bn_x_mean": jnp.linspace(0.02, -0.02, out_channels, dtype=jnp.float32),
        "bn_x_var": jnp.linspace(1.05, 0.95, out_channels, dtype=jnp.float32),
        "bn_p_gamma": jnp.array([1.05], jnp.float32),
        "bn_p_beta": jnp.array([0.02], jnp.float32),
        "bn_p_mean": jnp.array([0.01], jnp.float32),
        "bn_p_var": jnp.array([0.98], jnp.float32),
    }
    return params


if __name__ == "__main__":
    N, Cin, Cg, Cout, H, W = 2, 4, 4, 8, 16, 16
    key = jax.random.PRNGKey(0)
    kg, kx, kp = jax.random.split(key, 3)

    g = jax.random.normal(kg, (N, Cg, H, W), jnp.float32)
    x = jax.random.normal(kx, (N, Cin, H, W), jnp.float32)
    params = _init_params(kp, Cin, Cg, Cout)

    out = attention_gate(g, x, params)
    out = jax.block_until_ready(out)

    ref = _reference(g, x, params)
    assert out.shape == (N, Cin, H, W)
    assert jnp.allclose(out, ref, atol=1e-5, rtol=1e-5), "mismatch vs reference"

    print("KERNEL_OK")
</pallas_src>

<mosaic_0001>
module attributes {stable_mosaic.version = 11 : i64} {
  func.func @_attention_gate_kernel(%arg0: i32, %arg1: i32, %arg2: memref<1x4x256xf32, #tpu.memory_space<vmem>>, %arg3: memref<1x4x256xf32, #tpu.memory_space<vmem>>, %arg4: memref<8x4xf32, #tpu.memory_space<vmem>>, %arg5: memref<8x4xf32, #tpu.memory_space<vmem>>, %arg6: memref<8x1xf32, #tpu.memory_space<vmem>>, %arg7: memref<1x8xf32, #tpu.memory_space<vmem>>, %arg8: memref<1x1xf32, #tpu.memory_space<smem>>, %arg9: memref<1x4x256xf32, #tpu.memory_space<vmem>>) attributes {dimension_semantics = [#tpu.dimension_semantics<parallel>, #tpu.dimension_semantics<parallel>], iteration_bounds = array<i64: 2, 1>, scalar_prefetch = 0 : i64, scratch_operands = 0 : i64, tpu.core_type = #tpu.core_type<tc>, window_params = [{transform_indices = @transform_0, window_bounds = array<i64: 1, 4, 256>}, {transform_indices = @transform_1, window_bounds = array<i64: 1, 4, 256>}, {pipeline_mode = #tpu.pipeline_mode<synchronous>, transform_indices = @transform_2, window_bounds = array<i64: 8, 4>}, {pipeline_mode = #tpu.pipeline_mode<synchronous>, transform_indices = @transform_3, window_bounds = array<i64: 8, 4>}, {pipeline_mode = #tpu.pipeline_mode<synchronous>, transform_indices = @transform_4, window_bounds = array<i64: 8, 1>}, {pipeline_mode = #tpu.pipeline_mode<synchronous>, transform_indices = @transform_5, window_bounds = array<i64: 1, 8>}, {transform_indices = @transform_6, window_bounds = array<i64: 1, 1>}, {transform_indices = @transform_7, window_bounds = array<i64: 1, 4, 256>}]} {
    %c0 = arith.constant 0 : index
    %c0_0 = arith.constant 0 : index
    %c0_1 = arith.constant 0 : index
    %0 = vector.load %arg2[%c0, %c0_0, %c0_1] : memref<1x4x256xf32, #tpu.memory_space<vmem>>, vector<1x4x256xf32>
    %1 = vector.shape_cast %0 : vector<1x4x256xf32> to vector<4x256xf32>
    %c0_2 = arith.constant 0 : index
    %c0_3 = arith.constant 0 : index
    %c0_4 = arith.constant 0 : index
    %2 = vector.load %arg3[%c0_2, %c0_3, %c0_4] : memref<1x4x256xf32, #tpu.memory_space<vmem>>, vector<1x4x256xf32>
    %3 = vector.shape_cast %2 : vector<1x4x256xf32> to vector<4x256xf32>
    %c0_5 = arith.constant 0 : index
    %c0_6 = arith.constant 0 : index
    %4 = vector.load %arg4[%c0_5, %c0_6] : memref<8x4xf32, #tpu.memory_space<vmem>>, vector<8x4xf32>
    %cst = arith.constant dense<0.000000e+00> : vector<8x256xf32>
    %5 = tpu.matmul %4, %1, %cst {dimension_numbers = #tpu.dot_dimension_numbers<[1], [0], [0], [1], [0, 0, 1, 1], [], []>} : vector<8x4xf32>, vector<4x256xf32>, vector<8x256xf32> -> vector<8x256xf32>
    %c0_7 = arith.constant 0 : index
    %c0_8 = arith.constant 0 : index
    %6 = vector.load %arg5[%c0_7, %c0_8] : memref<8x4xf32, #tpu.memory_space<vmem>>, vector<8x4xf32>
    %cst_9 = arith.constant dense<0.000000e+00> : vector<8x256xf32>
    %7 = tpu.matmul %6, %3, %cst_9 {dimension_numbers = #tpu.dot_dimension_numbers<[1], [0], [0], [1], [0, 0, 1, 1], [], []>} : vector<8x4xf32>, vector<4x256xf32>, vector<8x256xf32> -> vector<8x256xf32>
    %8 = arith.addf %5, %7 : vector<8x256xf32>
    %c0_10 = arith.constant 0 : index
    %c0_11 = arith.constant 0 : index
    %9 = vector.load %arg6[%c0_10, %c0_11] : memref<8x1xf32, #tpu.memory_space<vmem>>, vector<8x1xf32>
    %10 = vector.broadcast %9 : vector<8x1xf32> to vector<8x256xf32>
    %11 = arith.addf %8, %10 : vector<8x256xf32>
    %cst_12 = arith.constant 0.000000e+00 : f32
    %12 = vector.broadcast %cst_12 : f32 to vector<8x256xf32>
    %13 = arith.maximumf %11, %12 : vector<8x256xf32>
    %c0_13 = arith.constant 0 : index
    %c0_14 = arith.constant 0 : index
    %14 = vector.load %arg7[%c0_13, %c0_14] : memref<1x8xf32, #tpu.memory_space<vmem>>, vector<1x8xf32>
    %cst_15 = arith.constant dense<0.000000e+00> : vector<1x256xf32>
    %15 = tpu.matmul %14, %13, %cst_15 {dimension_numbers = #tpu.dot_dimension_numbers<[1], [0], [0], [1], [0, 0, 1, 1], [], []>} : vector<1x8xf32>, vector<8x256xf32>, vector<1x256xf32> -> vector<1x256xf32>
    %c0_16 = arith.constant 0 : index
    %c0_17 = arith.constant 0 : index
    %16 = memref.load %arg8[%c0_16, %c0_17] : memref<1x1xf32, #tpu.memory_space<smem>>
    %17 = vector.broadcast %16 : f32 to vector<1x256xf32>
    %18 = arith.addf %15, %17 : vector<1x256xf32>
    %19 = arith.negf %18 : vector<1x256xf32>
    %20 = math.exp %19 : vector<1x256xf32>
    %cst_18 = arith.constant 1.000000e+00 : f32
    %21 = vector.broadcast %cst_18 : f32 to vector<1x256xf32>
    %22 = arith.addf %21, %20 : vector<1x256xf32>
    %23 = arith.divf %21, %22 : vector<1x256xf32>
    %24 = vector.broadcast %23 : vector<1x256xf32> to vector<4x256xf32>
    %25 = arith.mulf %3, %24 : vector<4x256xf32>
    %c0_19 = arith.constant 0 : index
    %c0_20 = arith.constant 0 : index
    %c0_21 = arith.constant 0 : index
    %26 = vector.load %arg9[%c0_19, %c0_20, %c0_21] : memref<1x4x256xf32, #tpu.memory_space<vmem>>, vector<1x4x256xf32>
    %27 = vector.shape_cast %26 : vector<1x4x256xf32> to vector<4x256xf32>
    %28 = vector.shape_cast %25 : vector<4x256xf32> to vector<1x4x256xf32>
    tpu.vector_store %arg9[%c0_19, %c0_20, %c0_21], %28 {strides = array<i32>} : memref<1x4x256xf32, #tpu.memory_space<vmem>>, vector<1x4x256xf32>,
    return
  }
  func.func @transform_0(%arg0: i32, %arg1: i32) -> (i32, i32, i32) {
    %c0_i32 = arith.constant 0 : i32
    %c0_i32_0 = arith.constant 0 : i32
    return %arg0, %c0_i32, %arg1 : i32, i32, i32
  }
  func.func @transform_1(%arg0: i32, %arg1: i32) -> (i32, i32, i32) {
    %c0_i32 = arith.constant 0 : i32
    %c0_i32_0 = arith.constant 0 : i32
    return %arg0, %c0_i32, %arg1 : i32, i32, i32
  }
  func.func @transform_2(%arg0: i32, %arg1: i32) -> (i32, i32) {
    %c0_i32 = arith.constant 0 : i32
    %c0_i32_0 = arith.constant 0 : i32
    %c0_i32_1 = arith.constant 0 : i32
    return %c0_i32, %c0_i32_0 : i32, i32
  }
  func.func @transform_3(%arg0: i32, %arg1: i32) -> (i32, i32) {
    %c0_i32 = arith.constant 0 : i32
    %c0_i32_0 = arith.constant 0 : i32
    %c0_i32_1 = arith.constant 0 : i32
    return %c0_i32, %c0_i32_0 : i32, i32
  }
  func.func @transform_4(%arg0: i32, %arg1: i32) -> (i32, i32) {
    %c0_i32 = arith.constant 0 : i32
    %c0_i32_0 = arith.constant 0 : i32
    %c0_i32_1 = arith.constant 0 : i32
    return %c0_i32, %c0_i32_0 : i32, i32
  }
  func.func @transform_5(%arg0: i32, %arg1: i32) -> (i32, i32) {
    %c0_i32 = arith.constant 0 : i32
    %c0_i32_0 = arith.constant 0 : i32
    %c0_i32_1 = arith.constant 0 : i32
    return %c0_i32, %c0_i32_0 : i32, i32
  }
  func.func @transform_6(%arg0: i32, %arg1: i32) -> (i32, i32) {
    %c0_i32 = arith.constant 0 : i32
    %c0_i32_0 = arith.constant 0 : i32
    %c0_i32_1 = arith.constant 0 : i32
    return %c0_i32, %c0_i32_0 : i32, i32
  }
  func.func @transform_7(%arg0: i32, %arg1: i32) -> (i32, i32, i32) {
    %c0_i32 = arith.constant 0 : i32
    %c0_i32_0 = arith.constant 0 : i32
    return %arg0, %c0_i32, %arg1 : i32, i32, i32
  }
}

</mosaic_0001>

<bundles_post_ra>
// kernel: attention_gate.1
= control target key start
LH: loop header
LB: loop body
LE: loop exit
PB: predicated region body
PF: predicated region fallthrough
CT: control target
= control target key end

     0   :  { %s873_s26 = smov 0   ;;  %s875_s27 = smov 0   ;;  %s926_s0 = inlined_call_operand.vmem [shape: f32[2,4,256], index: 0, kind: input, shape index: {}]   ;;  %s927_s1 = inlined_call_operand.vmem [shape: f32[2,4,256], index: 1, kind: input, shape index: {}]   ;;  %s928_s2 = inlined_call_operand.vmem [shape: f32[8,4], index: 2, kind: input, shape index: {}]   ;;  %s929_s3 = inlined_call_operand.vmem [shape: f32[8,4], index: 3, kind: input, shape index: {}]   ;;  %s930_s4 = inlined_call_operand.vmem [shape: f32[8,1], index: 4, kind: input, shape index: {}]   ;;  %s931_s5 = inlined_call_operand.vmem [shape: f32[1,8], index: 5, kind: input, shape index: {}]   ;;  %s932_s6 = inlined_call_operand.<no memory space> [shape: f32[1,1], index: 6, kind: input, shape index: {}]   ;;  %s933_s7 = inlined_call_operand.vmem [shape: f32[2,4,256], index: 7, kind: output, shape index: {}]  }
   0x1   :  { %12 = sst [smem:[#allocation2]] %s932_s6  ;;  %s877_s28 = smov 0  }
   0x2 LB: > { %s30_s6 = sadd.s32 1, %s822_s27  ;;  %p744_p0 = scmp.ge.s32.totalorder %s826_s28, 1  ;;  %s826_s28 = sphi %s877_s28, %s18_s28   ;;  %s822_s27 = sphi %s875_s27, %s935_s27   ;;  %s818_s26 = sphi %s873_s26, %s934_s26  }
   0x3   : > { %p32_p1 = scmp.ge.s32.totalorder %s30_s6, 2  ;;  %p276_p2 = scmp.lt.s32.totalorder %s826_s28, 3 }
   0x5   : > { %s937_s6 = smov (%p32_p1, %s30_s6), 0  ;;  %p277_p3 = pnand %p744_p0, %p276_p2 }
   0x6   : > { %p326_p4 = scmp.lt.s32.totalorder (!%p277_p3), %s818_s26, 1  ;;  %v828_v0 = vmov (!%p277_p3), 0.0   ;;  %v521_v1 = vld [vmem:[%s930_s4] sm:$0xff] (!%p277_p3)  ;;  %v829_v2 = vmov (!%p277_p3), 0   ;;  %vm365_vm0 = vcmask (!%p277_p3), 1043456   ;;  %vm361_vm1 = vcmask (!%p277_p3), 31744  }
   0x7   : > { %280 = sbr.rel (%p277_p3) target bundleno = 497 (0x1f1), region = 48  ;;  %434 = vmatprep.mubr.f32.mxu0 (!%p277_p3), %v828_v0  ;;  %602 = vmatprep.mubr.f32.mxu1 (!%p277_p3), %v828_v0  ;;  %v358_v7 = vld [vmem:[%s929_s3] sm:$0xff] (!%p277_p3)  ;;  %vm534_vm2 = vcmask (!%p277_p3), 64512   ;;  %s532_s21 = sld [smem:[#allocation2]] (!%p277_p3)  ;;  %v621_v27 = vlaneseq (!%p277_p3) }
   0x8   : > { %793 = vset.pattern.permute.xlu0 (!%p277_p3), %v829_v2  ;;  %v357_v8 = vld [vmem:[%s928_s2] sm:$0xff] (!%p277_p3) }
   0x9   : > { %524 = vperm.xlu0 (!%p277_p3), %793, %v521_v1   ;;  %v531_v16 = vld [vmem:[%s931_s5] sm:$0x1] (!%p277_p3)  ;;  %v622_v29 = vshrl.u32 (!%p277_p3), %v621_v27, 7 }
   0xb   : > { %v623_v30 = vsub.s32 (!%p277_p3), 0, %v622_v29 }
   0xd   : > { %v533_v17 = vstv (!%p277_p3), %s532_s21 }
   0xe   : > { %s939_s26 = smov (!%p326_p4, %s818_s26), 1 }
   0xf   : > { %s894_s8 = sshll.u32 %s939_s26, 3 }
  0x10   : > { %s333_s11 = scalar_lea.vmem %s926_s0, %s894_s8  ;;  %s343_s14 = scalar_lea.vmem %s927_s1, %s894_s8 }
  0x11   : > { %v356_v3 = vld [vmem:[%s343_s14] sm:$0xff]  ;;  %s353_s24 = scalar_lea.vmem %s933_s7, %s894_s8 }
  0x12   : > { %v355_v4 = vld [vmem:[%s333_s11] sm:$0xff]  ;;  %v360_v5 = vcombine.high %v356_v3, %v356_v3 }
  0x13   : > { %v442_v6 = vcombine.high %v355_v4, %v355_v4 }
  0x14   : > { %751 = vmatprep.subr.msk.mxu0 %vm365_vm0, %v360_v5 }
  0x15   : > { %752 = vmatpush1.msk.msra.mxu0 %vm365_vm0, %v356_v3 }
  0x16   : > { %753 = vmatmul.mubr.msk.f32.vlgmr.msra.gmra.mrb[0].mxu0 %vm361_vm1, %v358_v7  ;;  %754 = vmatprep.subr.msk.mxu0 %vm365_vm0, %v442_v6 }
  0x17   : > { %755 = vmatpush1.msk.msra.mxu0 %vm365_vm0, %v355_v4  ;;  %514 = vmatprep.mubr.f32.mxu0 %v828_v0 }
  0x1e   : > { %756 = vmatmul.mubr.msk.f32.vlgmr.msra.gmra.mrb[0].mxu0 %vm361_vm1, %v357_v8 }
  0x88   : > { %v525_v9 = vpop.permute.xlu0 %524 }
  0xf1   : > { %v516_v10 = vpop.f32.mrb[0].mxu0 }
  0xf2   : > { %v527_v11 = vadd.f32 %v525_v9, %v516_v10  ;;  %v518_v12 = vpop.f32.mrb[1].mxu0 }
  0xf3   : > { %v528_v13 = vadd.f32 %v525_v9, %v518_v12 }
  0xf4   : > { %v529_v15 = vmax.f32 %v527_v11, 0.0 }
  0xf5   : > { %v530_v14 = vmax.f32 %v528_v13, 0.0 }
  0xf7   : > { %538 = vmatprep.subr.mxu1 %v530_v14 }
  0xf8   : > { %539 = vmatpush1.msra.mxu1 %v529_v15 }
  0xf9   : > { %757 = vmatmul.mubr.msk.f32.vlgmr.msra.gmra.mrb[0].mxu1 %vm534_vm2, %v531_v16 }
 0x1cc   : > { %v604_v18 = vpop.f32.mrb[0].mxu1 }
 0x1cd   : > { %v605_v19 = vadd.f32 %v604_v18, %v533_v17  ;;  %v606_v20 = vpop.f32.mrb[1].mxu1 }
 0x1ce   : > { %v607_v21 = vadd.f32 %v606_v20, %v533_v17 }
 0x1cf   : > { %v758_v22 = vmul.f32 -1.442695, %v605_v19 }
 0x1d0   : > { %v759_v23 = vmul.f32 -1.442695, %v607_v21 }
 0x1d1   : > { %796 = vpow2.f32 %v758_v22 }
 0x1d2   : > { %798 = vpow2.f32 %v759_v23 }
 0x1db   : > { %v797_v24 = vpop.eup %796 }
 0x1dc   : > { %v799_v25 = vpop.eup %798  ;;  %v615_v26 = vadd.f32 1.0, %v797_v24 }
 0x1dd   : > { %v616_v28 = vadd.f32 1.0, %v799_v25 }
 0x1de   : > { %800 = vrcp.f32 %v615_v26 }
 0x1df   : > { %802 = vrcp.f32 %v616_v28 }
 0x1e8   : > { %v801_v31 = vpop.eup %800 }
 0x1e9   : > { %v803_v32 = vpop.eup %802  ;;  %v624_v33 = vrot.slane %v801_v31, %v623_v30 }
 0x1ea   : > { %v628_v34 = vrot.slane %v803_v32, %v623_v30 }
 0x1ec   : > { %v631_v35 = vcombine.low %v624_v33, %v628_v34 }
 0x1ee   : > { %v633_v36 = vmul.f32 %v631_v35, %v356_v3 }
 0x1f0   : > { %634 = vst [vmem:[%s353_s24] sm:$0xff] %v633_v36 }
 0x1f1 PF: > { %s18_s28 = sadd.s32 1, %s826_s28   ;;  %s934_s26 = smov %s822_s27 }
 0x1f2   : > { %p15_p5 = scmp.ge.s32.totalorder %s18_s28, 4   ;;  %s935_s27 = smov %s937_s6 }
 0x1f4   :  { %17 = sbr.rel (!%p15_p5) target bundleno = 2 (0x2), region = 81 }

</bundles_post_ra>
